<compile_context>
chip_gen: v6e
topology: v6e:2x2x1
jax: 0.10.0
libtpu: 0.0.40
codegen_flags: <defaults>
</compile_context>

<pallas_src>
import jax
import jax.numpy as jnp
from jax.experimental import pallas as pl
from jax.experimental.pallas import tpu as pltpu


def lstm_chunk_kernel(xp_ref, whh_t_ref, wfc_t_ref, bfc_ref, out_ref,
                      h_sc, c_sc):
    """One grid step == one chunk of Tc time steps.

    xp_ref    : (Tc, B, 4H) pre-projected inputs (x @ W_ih^T + b_ih + b_hh),
                time-major so xp_ref[t] is a clean (B, 4H) lane-aligned tile
    whh_t_ref : (H, 4H)     W_hh^T (gate order i, f, g, o — PyTorch layout)
    wfc_t_ref : (H, O)      fc weight, pre-transposed
    bfc_ref   : (1, O)      fc bias
    out_ref   : (B, O)      logits, written on the last chunk only
    h_sc,c_sc : (B, H) f32  hidden / cell state carried across chunks
    """
    ci = pl.program_id(0)
    Tc, B, G = xp_ref.shape
    H = G // 4

    @pl.when(ci == 0)
    def _():
        h_sc[...] = jnp.zeros_like(h_sc)
        c_sc[...] = jnp.zeros_like(c_sc)

    whh_t = whh_t_ref[...]  # hoist weight load out of the unrolled loop

    def step(t, carry):
        h, c = carry
        # Only recurrent matmul on the serial path: (B, H) x (H, 4H).
        gates = xp_ref[t] + jnp.dot(h, whh_t,
                                    preferred_element_type=jnp.float32)
        i_g = jax.nn.sigmoid(gates[:, 0 * H:1 * H])
        f_g = jax.nn.sigmoid(gates[:, 1 * H:2 * H])
        g_g = jnp.tanh(gates[:, 2 * H:3 * H])
        o_g = jax.nn.sigmoid(gates[:, 3 * H:4 * H])
        c_new = f_g * c + i_g * g_g
        h_new = o_g * jnp.tanh(c_new)
        return h_new, c_new

    h_last, c_last = jax.lax.fori_loop(
        0, Tc, step, (h_sc[...], c_sc[...]), unroll=True)
    h_sc[...] = h_last
    c_sc[...] = c_last

    @pl.when(ci == pl.num_programs(0) - 1)
    def _():
        out_ref[...] = (
            jnp.dot(h_last, wfc_t_ref[...], preferred_element_type=jnp.float32)
            + bfc_ref[...]
        ).astype(out_ref.dtype)


def _pick_time_chunk(T, max_chunk=32):
    for tc in range(min(T, max_chunk), 0, -1):
        if T % tc == 0:
            return tc
    return T


def lstm_forward(x_idx, params):
    """x_idx: (B, T) int32 token ids -> (B, output_size) float32 logits."""
    emb = params["embedding"]       # (V, H)
    w_ih = params["w_ih"]           # (4H, H)  PyTorch layout, gates [i,f,g,o]
    w_hh = params["w_hh"]           # (4H, H)
    b_ih = params["b_ih"]           # (4H,)
    b_hh = params["b_hh"]           # (4H,)
    w_fc = params["w_fc"]           # (O, H)
    b_fc = params["b_fc"]           # (O,)

    B, T = x_idx.shape
    H = emb.shape[1]
    O = w_fc.shape[0]
    G = 4 * H

    # Pad batch to a multiple of 8 sublanes (f32).
    B_pad = max(8, ((B + 7) // 8) * 8)
    if B_pad != B:
        x_idx = jnp.pad(x_idx, ((0, B_pad - B), (0, 0)))

    # ---- glue in plain JAX (off the serial critical path) ------------------
    # TODO(synk): fuse the embedding gather into the kernel (scalar-prefetched
    # token ids + pl.Element index_map) for large vocab / long sequences.
    x_emb = jnp.take(emb, x_idx, axis=0).astype(jnp.float32)         # (B_pad, T, H)
    b = (b_ih + b_hh).astype(jnp.float32)                            # (4H,)
    # Hoisted input projection: one big (B_pad*T, H) x (H, 4H) matmul.
    x_proj = jnp.einsum("bth,gh->btg", x_emb, w_ih.astype(jnp.float32),
                        precision=jax.lax.Precision.HIGHEST) + b     # (B_pad, T, 4H)
    xp = jnp.transpose(x_proj, (1, 0, 2))                            # (T, B_pad, 4H)

    whh_t = jnp.transpose(w_hh).astype(jnp.float32)                  # (H, 4H)
    wfc_t = jnp.transpose(w_fc).astype(jnp.float32)                  # (H, O)
    bfc = b_fc.reshape(1, O).astype(jnp.float32)                     # (1, O)

    Tc = _pick_time_chunk(T)
    n_chunks = T // Tc

    grid_spec = pltpu.PrefetchScalarGridSpec(
        num_scalar_prefetch=0,
        grid=(n_chunks,),
        in_specs=[
            pl.BlockSpec((Tc, B_pad, G), lambda c: (c, 0, 0)),  # x_proj chunk
            pl.BlockSpec((H, G), lambda c: (0, 0)),             # W_hh^T (resident)
            pl.BlockSpec((H, O), lambda c: (0, 0)),             # fc weight^T
            pl.BlockSpec((1, O), lambda c: (0, 0)),             # fc bias
        ],
        out_specs=pl.BlockSpec((B_pad, O), lambda c: (0, 0)),   # resident output
        scratch_shapes=[
            pltpu.VMEM((B_pad, H), jnp.float32),   # h_t
            pltpu.VMEM((B_pad, H), jnp.float32),   # c_t
        ],
    )

    out = pl.pallas_call(
        lstm_chunk_kernel,
        out_shape=jax.ShapeDtypeStruct((B_pad, O), jnp.float32),
        grid_spec=grid_spec,
        compiler_params=pltpu.CompilerParams(
            dimension_semantics=("arbitrary",),   # time recurrence is sequential
        ),
    )(xp, whh_t, wfc_t, bfc)
    return out[:B]


def init_params(key, input_size, hidden_size, output_size):
    ks = jax.random.split(key, 7)
    k = 1.0 / jnp.sqrt(hidden_size)
    H4 = 4 * hidden_size
    return {
        "embedding": jax.random.normal(ks[0], (input_size, hidden_size), jnp.float32),
        "w_ih": jax.random.uniform(ks[1], (H4, hidden_size), jnp.float32, -k, k),
        "w_hh": jax.random.uniform(ks[2], (H4, hidden_size), jnp.float32, -k, k),
        "b_ih": jax.random.uniform(ks[3], (H4,), jnp.float32, -k, k),
        "b_hh": jax.random.uniform(ks[4], (H4,), jnp.float32, -k, k),
        "w_fc": jax.random.uniform(ks[5], (output_size, hidden_size), jnp.float32, -k, k),
        "b_fc": jax.random.uniform(ks[6], (output_size,), jnp.float32, -k, k),
    }


if __name__ == "__main__":
    # Small shapes: vocab=50, hidden=32, output=2, batch=2, seq=8
    input_size, hidden_size, output_size = 50, 32, 2
    B, T = 2, 8

    key = jax.random.PRNGKey(0)
    k_param, k_data = jax.random.split(key)
    params = init_params(k_param, input_size, hidden_size, output_size)
    x_idx = jax.random.randint(k_data, (B, T), 0, input_size, dtype=jnp.int32)

    logits = lstm_forward(x_idx, params)
    jax.block_until_ready(logits)

    # Pure-JAX reference, same math as torch.nn.LSTM(batch_first=True) + fc on
    # the last time step.
    def ref_forward(x_idx, p):
        H = p["embedding"].shape[1]
        hp = jax.lax.Precision.HIGHEST
        xe = jnp.take(p["embedding"], x_idx, axis=0)
        h = jnp.zeros((x_idx.shape[0], H), jnp.float32)
        c = jnp.zeros((x_idx.shape[0], H), jnp.float32)
        for t in range(x_idx.shape[1]):
            gates = (jnp.dot(xe[:, t, :], p["w_ih"].T, precision=hp) + p["b_ih"]
                     + jnp.dot(h, p["w_hh"].T, precision=hp) + p["b_hh"])
            i_g = jax.nn.sigmoid(gates[:, 0 * H:1 * H])
            f_g = jax.nn.sigmoid(gates[:, 1 * H:2 * H])
            g_g = jnp.tanh(gates[:, 2 * H:3 * H])
            o_g = jax.nn.sigmoid(gates[:, 3 * H:4 * H])
            c = f_g * c + i_g * g_g
            h = o_g * jnp.tanh(c)
        return jnp.dot(h, p["w_fc"].T, precision=hp) + p["b_fc"]

    ref = ref_forward(x_idx, params)
    assert jnp.allclose(logits, ref, atol=1e-4, rtol=1e-4), (logits, ref)

    print("KERNEL_OK")
</pallas_src>

<mosaic_0001>
module attributes {stable_mosaic.version = 11 : i64} {
  func.func @lstm_chunk_kernel(%arg0: i32, %arg1: memref<8x8x128xf32, #tpu.memory_space<vmem>>, %arg2: memref<32x128xf32, #tpu.memory_space<vmem>>, %arg3: memref<32x2xf32, #tpu.memory_space<vmem>>, %arg4: memref<1x2xf32, #tpu.memory_space<vmem>>, %arg5: memref<8x2xf32, #tpu.memory_space<vmem>>, %arg6: memref<8x32xf32, #tpu.memory_space<vmem>>, %arg7: memref<8x32xf32, #tpu.memory_space<vmem>>) attributes {dimension_semantics = [#tpu.dimension_semantics<arbitrary>], iteration_bounds = array<i64: 1>, scalar_prefetch = 0 : i64, scratch_operands = 2 : i64, tpu.core_type = #tpu.core_type<tc>, window_params = [{transform_indices = @transform_0, window_bounds = array<i64: 8, 8, 128>}, {pipeline_mode = #tpu.pipeline_mode<synchronous>, transform_indices = @transform_1, window_bounds = array<i64: 32, 128>}, {pipeline_mode = #tpu.pipeline_mode<synchronous>, transform_indices = @transform_2, window_bounds = array<i64: 32, 2>}, {pipeline_mode = #tpu.pipeline_mode<synchronous>, transform_indices = @transform_3, window_bounds = array<i64: 1, 2>}, {pipeline_mode = #tpu.pipeline_mode<synchronous>, transform_indices = @transform_4, window_bounds = array<i64: 8, 2>}]} {
    %c0_i32 = arith.constant 0 : i32
    %0 = arith.cmpi eq, %arg0, %c0_i32 : i32
    %1 = arith.extui %0 : i1 to i32
    %c0_i32_0 = arith.constant 0 : i32
    %2 = arith.cmpi ne, %1, %c0_i32_0 : i32
    scf.if %2 {
      %cst_60 = arith.constant 0.000000e+00 : f32
      %251 = vector.broadcast %cst_60 : f32 to vector<8x32xf32>
      %c0_61 = arith.constant 0 : index
      %c0_62 = arith.constant 0 : index
      %252 = vector.load %arg6[%c0_61, %c0_62] : memref<8x32xf32, #tpu.memory_space<vmem>>, vector<8x32xf32>
      tpu.vector_store %arg6[%c0_61, %c0_62], %251 {strides = array<i32>} : memref<8x32xf32, #tpu.memory_space<vmem>>, vector<8x32xf32>,
      %cst_63 = arith.constant 0.000000e+00 : f32
      %253 = vector.broadcast %cst_63 : f32 to vector<8x32xf32>
      %c0_64 = arith.constant 0 : index
      %c0_65 = arith.constant 0 : index
      %254 = vector.load %arg7[%c0_64, %c0_65] : memref<8x32xf32, #tpu.memory_space<vmem>>, vector<8x32xf32>
      tpu.vector_store %arg7[%c0_64, %c0_65], %253 {strides = array<i32>} : memref<8x32xf32, #tpu.memory_space<vmem>>, vector<8x32xf32>,
    } else {
    }
    %c0 = arith.constant 0 : index
    %c0_1 = arith.constant 0 : index
    %3 = vector.load %arg2[%c0, %c0_1] : memref<32x128xf32, #tpu.memory_space<vmem>>, vector<32x128xf32>
    %c0_2 = arith.constant 0 : index
    %c0_3 = arith.constant 0 : index
    %4 = vector.load %arg6[%c0_2, %c0_3] : memref<8x32xf32, #tpu.memory_space<vmem>>, vector<8x32xf32>
    %c0_4 = arith.constant 0 : index
    %c0_5 = arith.constant 0 : index
    %5 = vector.load %arg7[%c0_4, %c0_5] : memref<8x32xf32, #tpu.memory_space<vmem>>, vector<8x32xf32>
    %c0_i32_6 = arith.constant 0 : i32
    %6 = arith.index_cast %c0_i32_6 : i32 to index
    %c0_7 = arith.constant 0 : index
    %c0_8 = arith.constant 0 : index
    %7 = vector.load %arg1[%6, %c0_7, %c0_8] : memref<8x8x128xf32, #tpu.memory_space<vmem>>, vector<1x8x128xf32>
    %8 = vector.shape_cast %7 : vector<1x8x128xf32> to vector<8x128xf32>
    %cst = arith.constant dense<0.000000e+00> : vector<8x128xf32>
    %9 = tpu.matmul %4, %3, %cst {dimension_numbers = #tpu.dot_dimension_numbers<[1], [0], [0], [1], [0, 0, 1, 1], [], []>} : vector<8x32xf32>, vector<32x128xf32>, vector<8x128xf32> -> vector<8x128xf32>
    %10 = arith.addf %8, %9 : vector<8x128xf32>
    %11 = vector.extract_strided_slice %10 {offsets = [0, 0], sizes = [8, 32], strides = [1, 1]} : vector<8x128xf32> to vector<8x32xf32>
    %12 = arith.negf %11 : vector<8x32xf32>
    %13 = math.exp %12 : vector<8x32xf32>
    %cst_9 = arith.constant 1.000000e+00 : f32
    %14 = vector.broadcast %cst_9 : f32 to vector<8x32xf32>
    %15 = arith.addf %14, %13 : vector<8x32xf32>
    %16 = arith.divf %14, %15 : vector<8x32xf32>
    %17 = vector.extract_strided_slice %10 {offsets = [0, 32], sizes = [8, 32], strides = [1, 1]} : vector<8x128xf32> to vector<8x32xf32>
    %18 = arith.negf %17 : vector<8x32xf32>
    %19 = math.exp %18 : vector<8x32xf32>
    %cst_10 = arith.constant 1.000000e+00 : f32
    %20 = vector.broadcast %cst_10 : f32 to vector<8x32xf32>
    %21 = arith.addf %20, %19 : vector<8x32xf32>
    %22 = arith.divf %20, %21 : vector<8x32xf32>
    %23 = vector.extract_strided_slice %10 {offsets = [0, 64], sizes = [8, 32], strides = [1, 1]} : vector<8x128xf32> to vector<8x32xf32>
    %24 = math.tanh %23 : vector<8x32xf32>
    %25 = vector.extract_strided_slice %10 {offsets = [0, 96], sizes = [8, 32], strides = [1, 1]} : vector<8x128xf32> to vector<8x32xf32>
    %26 = arith.negf %25 : vector<8x32xf32>
    %27 = math.exp %26 : vector<8x32xf32>
    %cst_11 = arith.constant 1.000000e+00 : f32
    %28 = vector.broadcast %cst_11 : f32 to vector<8x32xf32>
    %29 = arith.addf %28, %27 : vector<8x32xf32>
    %30 = arith.divf %28, %29 : vector<8x32xf32>
    %31 = arith.mulf %22, %5 : vector<8x32xf32>
    %32 = arith.mulf %16, %24 : vector<8x32xf32>
    %33 = arith.addf %31, %32 : vector<8x32xf32>
    %34 = math.tanh %33 : vector<8x32xf32>
    %35 = arith.mulf %30, %34 : vector<8x32xf32>
    %c1_i32 = arith.constant 1 : i32
    %36 = arith.index_cast %c1_i32 : i32 to index
    %c0_12 = arith.constant 0 : index
    %c0_13 = arith.constant 0 : index
    %37 = vector.load %arg1[%36, %c0_12, %c0_13] : memref<8x8x128xf32, #tpu.memory_space<vmem>>, vector<1x8x128xf32>
    %38 = vector.shape_cast %37 : vector<1x8x128xf32> to vector<8x128xf32>
    %cst_14 = arith.constant dense<0.000000e+00> : vector<8x128xf32>
    %39 = tpu.matmul %35, %3, %cst_14 {dimension_numbers = #tpu.dot_dimension_numbers<[1], [0], [0], [1], [0, 0, 1, 1], [], []>} : vector<8x32xf32>, vector<32x128xf32>, vector<8x128xf32> -> vector<8x128xf32>
    %40 = arith.addf %38, %39 : vector<8x128xf32>
    %41 = vector.extract_strided_slice %40 {offsets = [0, 0], sizes = [8, 32], strides = [1, 1]} : vector<8x128xf32> to vector<8x32xf32>
    %42 = arith.negf %41 : vector<8x32xf32>
    %43 = math.exp %42 : vector<8x32xf32>
    %cst_15 = arith.constant 1.000000e+00 : f32
    %44 = vector.broadcast %cst_15 : f32 to vector<8x32xf32>
    %45 = arith.addf %44, %43 : vector<8x32xf32>
    %46 = arith.divf %44, %45 : vector<8x32xf32>
    %47 = vector.extract_strided_slice %40 {offsets = [0, 32], sizes = [8, 32], strides = [1, 1]} : vector<8x128xf32> to vector<8x32xf32>
    %48 = arith.negf %47 : vector<8x32xf32>
    %49 = math.exp %48 : vector<8x32xf32>
    %cst_16 = arith.constant 1.000000e+00 : f32
    %50 = vector.broadcast %cst_16 : f32 to vector<8x32xf32>
    %51 = arith.addf %50, %49 : vector<8x32xf32>
    %52 = arith.divf %50, %51 : vector<8x32xf32>
    %53 = vector.extract_strided_slice %40 {offsets = [0, 64], sizes = [8, 32], strides = [1, 1]} : vector<8x128xf32> to vector<8x32xf32>
    %54 = math.tanh %53 : vector<8x32xf32>
    %55 = vector.extract_strided_slice %40 {offsets = [0, 96], sizes = [8, 32], strides = [1, 1]} : vector<8x128xf32> to vector<8x32xf32>
    %56 = arith.negf %55 : vector<8x32xf32>
    %57 = math.exp %56 : vector<8x32xf32>
    %cst_17 = arith.constant 1.000000e+00 : f32
    %58 = vector.broadcast %cst_17 : f32 to vector<8x32xf32>
    %59 = arith.addf %58, %57 : vector<8x32xf32>
    %60 = arith.divf %58, %59 : vector<8x32xf32>
    %61 = arith.mulf %52, %33 : vector<8x32xf32>
    %62 = arith.mulf %46, %54 : vector<8x32xf32>
    %63 = arith.addf %61, %62 : vector<8x32xf32>
    %64 = math.tanh %63 : vector<8x32xf32>
    %65 = arith.mulf %60, %64 : vector<8x32xf32>
    %c2_i32 = arith.constant 2 : i32
    %66 = arith.index_cast %c2_i32 : i32 to index
    %c0_18 = arith.constant 0 : index
    %c0_19 = arith.constant 0 : index
    %67 = vector.load %arg1[%66, %c0_18, %c0_19] : memref<8x8x128xf32, #tpu.memory_space<vmem>>, vector<1x8x128xf32>
    %68 = vector.shape_cast %67 : vector<1x8x128xf32> to vector<8x128xf32>
    %cst_20 = arith.constant dense<0.000000e+00> : vector<8x128xf32>
    %69 = tpu.matmul %65, %3, %cst_20 {dimension_numbers = #tpu.dot_dimension_numbers<[1], [0], [0], [1], [0, 0, 1, 1], [], []>} : vector<8x32xf32>, vector<32x128xf32>, vector<8x128xf32> -> vector<8x128xf32>
    %70 = arith.addf %68, %69 : vector<8x128xf32>
    %71 = vector.extract_strided_slice %70 {offsets = [0, 0], sizes = [8, 32], strides = [1, 1]} : vector<8x128xf32> to vector<8x32xf32>
    %72 = arith.negf %71 : vector<8x32xf32>
    %73 = math.exp %72 : vector<8x32xf32>
    %cst_21 = arith.constant 1.000000e+00 : f32
    %74 = vector.broadcast %cst_21 : f32 to vector<8x32xf32>
    %75 = arith.addf %74, %73 : vector<8x32xf32>
    %76 = arith.divf %74, %75 : vector<8x32xf32>
    %77 = vector.extract_strided_slice %70 {offsets = [0, 32], sizes = [8, 32], strides = [1, 1]} : vector<8x128xf32> to vector<8x32xf32>
    %78 = arith.negf %77 : vector<8x32xf32>
    %79 = math.exp %78 : vector<8x32xf32>
    %cst_22 = arith.constant 1.000000e+00 : f32
    %80 = vector.broadcast %cst_22 : f32 to vector<8x32xf32>
    %81 = arith.addf %80, %79 : vector<8x32xf32>
    %82 = arith.divf %80, %81 : vector<8x32xf32>
    %83 = vector.extract_strided_slice %70 {offsets = [0, 64], sizes = [8, 32], strides = [1, 1]} : vector<8x128xf32> to vector<8x32xf32>
    %84 = math.tanh %83 : vector<8x32xf32>
    %85 = vector.extract_strided_slice %70 {offsets = [0, 96], sizes = [8, 32], strides = [1, 1]} : vector<8x128xf32> to vector<8x32xf32>
    %86 = arith.negf %85 : vector<8x32xf32>
    %87 = math.exp %86 : vector<8x32xf32>
    %cst_23 = arith.constant 1.000000e+00 : f32
    %88 = vector.broadcast %cst_23 : f32 to vector<8x32xf32>
    %89 = arith.addf %88, %87 : vector<8x32xf32>
    %90 = arith.divf %88, %89 : vector<8x32xf32>
    %91 = arith.mulf %82, %63 : vector<8x32xf32>
    %92 = arith.mulf %76, %84 : vector<8x32xf32>
    %93 = arith.addf %91, %92 : vector<8x32xf32>
    %94 = math.tanh %93 : vector<8x32xf32>
    %95 = arith.mulf %90, %94 : vector<8x32xf32>
    %c3_i32 = arith.constant 3 : i32
    %96 = arith.index_cast %c3_i32 : i32 to index
    %c0_24 = arith.constant 0 : index
    %c0_25 = arith.constant 0 : index
    %97 = vector.load %arg1[%96, %c0_24, %c0_25] : memref<8x8x128xf32, #tpu.memory_space<vmem>>, vector<1x8x128xf32>
    %98 = vector.shape_cast %97 : vector<1x8x128xf32> to vector<8x128xf32>
    %cst_26 = arith.constant dense<0.000000e+00> : vector<8x128xf32>
    %99 = tpu.matmul %95, %3, %cst_26 {dimension_numbers = #tpu.dot_dimension_numbers<[1], [0], [0], [1], [0, 0, 1, 1], [], []>} : vector<8x32xf32>, vector<32x128xf32>, vector<8x128xf32> -> vector<8x128xf32>
    %100 = arith.addf %98, %99 : vector<8x128xf32>
    %101 = vector.extract_strided_slice %100 {offsets = [0, 0], sizes = [8, 32], strides = [1, 1]} : vector<8x128xf32> to vector<8x32xf32>
    %102 = arith.negf %101 : vector<8x32xf32>
    %103 = math.exp %102 : vector<8x32xf32>
    %cst_27 = arith.constant 1.000000e+00 : f32
    %104 = vector.broadcast %cst_27 : f32 to vector<8x32xf32>
    %105 = arith.addf %104, %103 : vector<8x32xf32>
    %106 = arith.divf %104, %105 : vector<8x32xf32>
    %107 = vector.extract_strided_slice %100 {offsets = [0, 32], sizes = [8, 32], strides = [1, 1]} : vector<8x128xf32> to vector<8x32xf32>
    %108 = arith.negf %107 : vector<8x32xf32>
    %109 = math.exp %108 : vector<8x32xf32>
    %cst_28 = arith.constant 1.000000e+00 : f32
    %110 = vector.broadcast %cst_28 : f32 to vector<8x32xf32>
    %111 = arith.addf %110, %109 : vector<8x32xf32>
    %112 = arith.divf %110, %111 : vector<8x32xf32>
    %113 = vector.extract_strided_slice %100 {offsets = [0, 64], sizes = [8, 32], strides = [1, 1]} : vector<8x128xf32> to vector<8x32xf32>
    %114 = math.tanh %113 : vector<8x32xf32>
    %115 = vector.extract_strided_slice %100 {offsets = [0, 96], sizes = [8, 32], strides = [1, 1]} : vector<8x128xf32> to vector<8x32xf32>
    %116 = arith.negf %115 : vector<8x32xf32>
    %117 = math.exp %116 : vector<8x32xf32>
    %cst_29 = arith.constant 1.000000e+00 : f32
    %118 = vector.broadcast %cst_29 : f32 to vector<8x32xf32>
    %119 = arith.addf %118, %117 : vector<8x32xf32>
    %120 = arith.divf %118, %119 : vector<8x32xf32>
    %121 = arith.mulf %112, %93 : vector<8x32xf32>
    %122 = arith.mulf %106, %114 : vector<8x32xf32>
    %123 = arith.addf %121, %122 : vector<8x32xf32>
    %124 = math.tanh %123 : vector<8x32xf32>
    %125 = arith.mulf %120, %124 : vector<8x32xf32>
    %c4_i32 = arith.constant 4 : i32
    %126 = arith.index_cast %c4_i32 : i32 to index
    %c0_30 = arith.constant 0 : index
    %c0_31 = arith.constant 0 : index
    %127 = vector.load %arg1[%126, %c0_30, %c0_31] : memref<8x8x128xf32, #tpu.memory_space<vmem>>, vector<1x8x128xf32>
    %128 = vector.shape_cast %127 : vector<1x8x128xf32> to vector<8x128xf32>
    %cst_32 = arith.constant dense<0.000000e+00> : vector<8x128xf32>
    %129 = tpu.matmul %125, %3, %cst_32 {dimension_numbers = #tpu.dot_dimension_numbers<[1], [0], [0], [1], [0, 0, 1, 1], [], []>} : vector<8x32xf32>, vector<32x128xf32>, vector<8x128xf32> -> vector<8x128xf32>
    %130 = arith.addf %128, %129 : vector<8x128xf32>
    %131 = vector.extract_strided_slice %130 {offsets = [0, 0], sizes = [8, 32], strides = [1, 1]} : vector<8x128xf32> to vector<8x32xf32>
    %132 = arith.negf %131 : vector<8x32xf32>
    %133 = math.exp %132 : vector<8x32xf32>
    %cst_33 = arith.constant 1.000000e+00 : f32
    %134 = vector.broadcast %cst_33 : f32 to vector<8x32xf32>
    %135 = arith.addf %134, %133 : vector<8x32xf32>
    %136 = arith.divf %134, %135 : vector<8x32xf32>
    %137 = vector.extract_strided_slice %130 {offsets = [0, 32], sizes = [8, 32], strides = [1, 1]} : vector<8x128xf32> to vector<8x32xf32>
    %138 = arith.negf %137 : vector<8x32xf32>
    %139 = math.exp %138 : vector<8x32xf32>
    %cst_34 = arith.constant 1.000000e+00 : f32
    %140 = vector.broadcast %cst_34 : f32 to vector<8x32xf32>
    %141 = arith.addf %140, %139 : vector<8x32xf32>
    %142 = arith.divf %140, %141 : vector<8x32xf32>
    %143 = vector.extract_strided_slice %130 {offsets = [0, 64], sizes = [8, 32], strides = [1, 1]} : vector<8x128xf32> to vector<8x32xf32>
    %144 = math.tanh %143 : vector<8x32xf32>
    %145 = vector.extract_strided_slice %130 {offsets = [0, 96], sizes = [8, 32], strides = [1, 1]} : vector<8x128xf32> to vector<8x32xf32>
    %146 = arith.negf %145 : vector<8x32xf32>
    %147 = math.exp %146 : vector<8x32xf32>
    %cst_35 = arith.constant 1.000000e+00 : f32
    %148 = vector.broadcast %cst_35 : f32 to vector<8x32xf32>
    %149 = arith.addf %148, %147 : vector<8x32xf32>
    %150 = arith.divf %148, %149 : vector<8x32xf32>
    %151 = arith.mulf %142, %123 : vector<8x32xf32>
    %152 = arith.mulf %136, %144 : vector<8x32xf32>
    %153 = arith.addf %151, %152 : vector<8x32xf32>
    %154 = math.tanh %153 : vector<8x32xf32>
    %155 = arith.mulf %150, %154 : vector<8x32xf32>
    %c5_i32 = arith.constant 5 : i32
    %156 = arith.index_cast %c5_i32 : i32 to index
    %c0_36 = arith.constant 0 : index
    %c0_37 = arith.constant 0 : index
    %157 = vector.load %arg1[%156, %c0_36, %c0_37] : memref<8x8x128xf32, #tpu.memory_space<vmem>>, vector<1x8x128xf32>
    %158 = vector.shape_cast %157 : vector<1x8x128xf32> to vector<8x128xf32>
    %cst_38 = arith.constant dense<0.000000e+00> : vector<8x128xf32>
    %159 = tpu.matmul %155, %3, %cst_38 {dimension_numbers = #tpu.dot_dimension_numbers<[1], [0], [0], [1], [0, 0, 1, 1], [], []>} : vector<8x32xf32>, vector<32x128xf32>, vector<8x128xf32> -> vector<8x128xf32>
    %160 = arith.addf %158, %159 : vector<8x128xf32>
    %161 = vector.extract_strided_slice %160 {offsets = [0, 0], sizes = [8, 32], strides = [1, 1]} : vector<8x128xf32> to vector<8x32xf32>
    %162 = arith.negf %161 : vector<8x32xf32>
    %163 = math.exp %162 : vector<8x32xf32>
    %cst_39 = arith.constant 1.000000e+00 : f32
    %164 = vector.broadcast %cst_39 : f32 to vector<8x32xf32>
    %165 = arith.addf %164, %163 : vector<8x32xf32>
    %166 = arith.divf %164, %165 : vector<8x32xf32>
    %167 = vector.extract_strided_slice %160 {offsets = [0, 32], sizes = [8, 32], strides = [1, 1]} : vector<8x128xf32> to vector<8x32xf32>
    %168 = arith.negf %167 : vector<8x32xf32>
    %169 = math.exp %168 : vector<8x32xf32>
    %cst_40 = arith.constant 1.000000e+00 : f32
    %170 = vector.broadcast %cst_40 : f32 to vector<8x32xf32>
    %171 = arith.addf %170, %169 : vector<8x32xf32>
    %172 = arith.divf %170, %171 : vector<8x32xf32>
    %173 = vector.extract_strided_slice %160 {offsets = [0, 64], sizes = [8, 32], strides = [1, 1]} : vector<8x128xf32> to vector<8x32xf32>
    %174 = math.tanh %173 : vector<8x32xf32>
    %175 = vector.extract_strided_slice %160 {offsets = [0, 96], sizes = [8, 32], strides = [1, 1]} : vector<8x128xf32> to vector<8x32xf32>
    %176 = arith.negf %175 : vector<8x32xf32>
    %177 = math.exp %176 : vector<8x32xf32>
    %cst_41 = arith.constant 1.000000e+00 : f32
    %178 = vector.broadcast %cst_41 : f32 to vector<8x32xf32>
    %179 = arith.addf %178, %177 : vector<8x32xf32>
    %180 = arith.divf %178, %179 : vector<8x32xf32>
    %181 = arith.mulf %172, %153 : vector<8x32xf32>
    %182 = arith.mulf %166, %174 : vector<8x32xf32>
    %183 = arith.addf %181, %182 : vector<8x32xf32>
    %184 = math.tanh %183 : vector<8x32xf32>
    %185 = arith.mulf %180, %184 : vector<8x32xf32>
    %c6_i32 = arith.constant 6 : i32
    %186 = arith.index_cast %c6_i32 : i32 to index
    %c0_42 = arith.constant 0 : index
    %c0_43 = arith.constant 0 : index
    %187 = vector.load %arg1[%186, %c0_42, %c0_43] : memref<8x8x128xf32, #tpu.memory_space<vmem>>, vector<1x8x128xf32>
    %188 = vector.shape_cast %187 : vector<1x8x128xf32> to vector<8x128xf32>
    %cst_44 = arith.constant dense<0.000000e+00> : vector<8x128xf32>
    %189 = tpu.matmul %185, %3, %cst_44 {dimension_numbers = #tpu.dot_dimension_numbers<[1], [0], [0], [1], [0, 0, 1, 1], [], []>} : vector<8x32xf32>, vector<32x128xf32>, vector<8x128xf32> -> vector<8x128xf32>
    %190 = arith.addf %188, %189 : vector<8x128xf32>
    %191 = vector.extract_strided_slice %190 {offsets = [0, 0], sizes = [8, 32], strides = [1, 1]} : vector<8x128xf32> to vector<8x32xf32>
    %192 = arith.negf %191 : vector<8x32xf32>
    %193 = math.exp %192 : vector<8x32xf32>
    %cst_45 = arith.constant 1.000000e+00 : f32
    %194 = vector.broadcast %cst_45 : f32 to vector<8x32xf32>
    %195 = arith.addf %194, %193 : vector<8x32xf32>
    %196 = arith.divf %194, %195 : vector<8x32xf32>
    %197 = vector.extract_strided_slice %190 {offsets = [0, 32], sizes = [8, 32], strides = [1, 1]} : vector<8x128xf32> to vector<8x32xf32>
    %198 = arith.negf %197 : vector<8x32xf32>
    %199 = math.exp %198 : vector<8x32xf32>
    %cst_46 = arith.constant 1.000000e+00 : f32
    %200 = vector.broadcast %cst_46 : f32 to vector<8x32xf32>
    %201 = arith.addf %200, %199 : vector<8x32xf32>
    %202 = arith.divf %200, %201 : vector<8x32xf32>
    %203 = vector.extract_strided_slice %190 {offsets = [0, 64], sizes = [8, 32], strides = [1, 1]} : vector<8x128xf32> to vector<8x32xf32>
    %204 = math.tanh %203 : vector<8x32xf32>
    %205 = vector.extract_strided_slice %190 {offsets = [0, 96], sizes = [8, 32], strides = [1, 1]} : vector<8x128xf32> to vector<8x32xf32>
    %206 = arith.negf %205 : vector<8x32xf32>
    %207 = math.exp %206 : vector<8x32xf32>
    %cst_47 = arith.constant 1.000000e+00 : f32
    %208 = vector.broadcast %cst_47 : f32 to vector<8x32xf32>
    %209 = arith.addf %208, %207 : vector<8x32xf32>
    %210 = arith.divf %208, %209 : vector<8x32xf32>
    %211 = arith.mulf %202, %183 : vector<8x32xf32>
    %212 = arith.mulf %196, %204 : vector<8x32xf32>
    %213 = arith.addf %211, %212 : vector<8x32xf32>
    %214 = math.tanh %213 : vector<8x32xf32>
    %215 = arith.mulf %210, %214 : vector<8x32xf32>
    %c7_i32 = arith.constant 7 : i32
    %216 = arith.index_cast %c7_i32 : i32 to index
    %c0_48 = arith.constant 0 : index
    %c0_49 = arith.constant 0 : index
    %217 = vector.load %arg1[%216, %c0_48, %c0_49] : memref<8x8x128xf32, #tpu.memory_space<vmem>>, vector<1x8x128xf32>
    %218 = vector.shape_cast %217 : vector<1x8x128xf32> to vector<8x128xf32>
    %cst_50 = arith.constant dense<0.000000e+00> : vector<8x128xf32>
    %219 = tpu.matmul %215, %3, %cst_50 {dimension_numbers = #tpu.dot_dimension_numbers<[1], [0], [0], [1], [0, 0, 1, 1], [], []>} : vector<8x32xf32>, vector<32x128xf32>, vector<8x128xf32> -> vector<8x128xf32>
    %220 = arith.addf %218, %219 : vector<8x128xf32>
    %221 = vector.extract_strided_slice %220 {offsets = [0, 0], sizes = [8, 32], strides = [1, 1]} : vector<8x128xf32> to vector<8x32xf32>
    %222 = arith.negf %221 : vector<8x32xf32>
    %223 = math.exp %222 : vector<8x32xf32>
    %cst_51 = arith.constant 1.000000e+00 : f32
    %224 = vector.broadcast %cst_51 : f32 to vector<8x32xf32>
    %225 = arith.addf %224, %223 : vector<8x32xf32>
    %226 = arith.divf %224, %225 : vector<8x32xf32>
    %227 = vector.extract_strided_slice %220 {offsets = [0, 32], sizes = [8, 32], strides = [1, 1]} : vector<8x128xf32> to vector<8x32xf32>
    %228 = arith.negf %227 : vector<8x32xf32>
    %229 = math.exp %228 : vector<8x32xf32>
    %cst_52 = arith.constant 1.000000e+00 : f32
    %230 = vector.broadcast %cst_52 : f32 to vector<8x32xf32>
    %231 = arith.addf %230, %229 : vector<8x32xf32>
    %232 = arith.divf %230, %231 : vector<8x32xf32>
    %233 = vector.extract_strided_slice %220 {offsets = [0, 64], sizes = [8, 32], strides = [1, 1]} : vector<8x128xf32> to vector<8x32xf32>
    %234 = math.tanh %233 : vector<8x32xf32>
    %235 = vector.extract_strided_slice %220 {offsets = [0, 96], sizes = [8, 32], strides = [1, 1]} : vector<8x128xf32> to vector<8x32xf32>
    %236 = arith.negf %235 : vector<8x32xf32>
    %237 = math.exp %236 : vector<8x32xf32>
    %cst_53 = arith.constant 1.000000e+00 : f32
    %238 = vector.broadcast %cst_53 : f32 to vector<8x32xf32>
    %239 = arith.addf %238, %237 : vector<8x32xf32>
    %240 = arith.divf %238, %239 : vector<8x32xf32>
    %241 = arith.mulf %232, %213 : vector<8x32xf32>
    %242 = arith.mulf %226, %234 : vector<8x32xf32>
    %243 = arith.addf %241, %242 : vector<8x32xf32>
    %244 = math.tanh %243 : vector<8x32xf32>
    %245 = arith.mulf %240, %244 : vector<8x32xf32>
    %c8_i32 = arith.constant 8 : i32
    %c0_54 = arith.constant 0 : index
    %c0_55 = arith.constant 0 : index
    %246 = vector.load %arg6[%c0_54, %c0_55] : memref<8x32xf32, #tpu.memory_space<vmem>>, vector<8x32xf32>
    tpu.vector_store %arg6[%c0_54, %c0_55], %245 {strides = array<i32>} : memref<8x32xf32, #tpu.memory_space<vmem>>, vector<8x32xf32>,
    %c0_56 = arith.constant 0 : index
    %c0_57 = arith.constant 0 : index
    %247 = vector.load %arg7[%c0_56, %c0_57] : memref<8x32xf32, #tpu.memory_space<vmem>>, vector<8x32xf32>
    tpu.vector_store %arg7[%c0_56, %c0_57], %243 {strides = array<i32>} : memref<8x32xf32, #tpu.memory_space<vmem>>, vector<8x32xf32>,
    %c0_i32_58 = arith.constant 0 : i32
    %248 = arith.cmpi eq, %arg0, %c0_i32_58 : i32
    %249 = arith.extui %248 : i1 to i32
    %c0_i32_59 = arith.constant 0 : i32
    %250 = arith.cmpi ne, %249, %c0_i32_59 : i32
    scf.if %250 {
      %c0_60 = arith.constant 0 : index
      %c0_61 = arith.constant 0 : index
      %251 = vector.load %arg3[%c0_60, %c0_61] : memref<32x2xf32, #tpu.memory_space<vmem>>, vector<32x2xf32>
      %cst_62 = arith.constant dense<0.000000e+00> : vector<8x2xf32>
      %252 = tpu.matmul %245, %251, %cst_62 {dimension_numbers = #tpu.dot_dimension_numbers<[1], [0], [0], [1], [0, 0, 1, 1], [], []>} : vector<8x32xf32>, vector<32x2xf32>, vector<8x2xf32> -> vector<8x2xf32>
      %c0_63 = arith.constant 0 : index
      %c0_64 = arith.constant 0 : index
      %253 = vector.load %arg4[%c0_63, %c0_64] : memref<1x2xf32, #tpu.memory_space<vmem>>, vector<1x2xf32>
      %254 = vector.broadcast %253 : vector<1x2xf32> to vector<8x2xf32>
      %255 = arith.addf %252, %254 : vector<8x2xf32>
      %c0_65 = arith.constant 0 : index
      %c0_66 = arith.constant 0 : index
      %256 = vector.load %arg5[%c0_65, %c0_66] : memref<8x2xf32, #tpu.memory_space<vmem>>, vector<8x2xf32>
      tpu.vector_store %arg5[%c0_65, %c0_66], %255 {strides = array<i32>} : memref<8x2xf32, #tpu.memory_space<vmem>>, vector<8x2xf32>,
    } else {
    }
    return
  }
  func.func @transform_0(%arg0: i32) -> (i32, i32, i32) {
    %c0_i32 = arith.constant 0 : i32
    %c0_i32_0 = arith.constant 0 : i32
    %c0_i32_1 = arith.constant 0 : i32
    return %arg0, %c0_i32, %c0_i32_0 : i32, i32, i32
  }
  func.func @transform_1(%arg0: i32) -> (i32, i32) {
    %c0_i32 = arith.constant 0 : i32
    %c0_i32_0 = arith.constant 0 : i32
    %c0_i32_1 = arith.constant 0 : i32
    return %c0_i32, %c0_i32_0 : i32, i32
  }
  func.func @transform_2(%arg0: i32) -> (i32, i32) {
    %c0_i32 = arith.constant 0 : i32
    %c0_i32_0 = arith.constant 0 : i32
    %c0_i32_1 = arith.constant 0 : i32
    return %c0_i32, %c0_i32_0 : i32, i32
  }
  func.func @transform_3(%arg0: i32) -> (i32, i32) {
    %c0_i32 = arith.constant 0 : i32
    %c0_i32_0 = arith.constant 0 : i32
    %c0_i32_1 = arith.constant 0 : i32
    return %c0_i32, %c0_i32_0 : i32, i32
  }
  func.func @transform_4(%arg0: i32) -> (i32, i32) {
    %c0_i32 = arith.constant 0 : i32
    %c0_i32_0 = arith.constant 0 : i32
    %c0_i32_1 = arith.constant 0 : i32
    return %c0_i32, %c0_i32_0 : i32, i32
  }
}

</mosaic_0001>

<bundles_post_ra>
// kernel: tpu_custom_call.1
= control target key start
LH: loop header
LB: loop body
LE: loop exit
PB: predicated region body
PF: predicated region fallthrough
CT: control target
= control target key end

     0   :  { %9 = vsyncpa [#allocation5], 0  ;;  %s1221_s15 = smov [#allocation4]   ;;  %s1429_s0 = inlined_call_operand.hbm [shape: f32[8,8,128], index: 0, kind: input, shape index: {}]   ;;  %s1430_s1 = inlined_call_operand.vmem [shape: f32[32,128], index: 1, kind: input, shape index: {}]   ;;  %s1431_s2 = inlined_call_operand.vmem [shape: f32[32,2], index: 2, kind: input, shape index: {}]   ;;  %s1432_s3 = inlined_call_operand.vmem [shape: f32[1,2], index: 3, kind: input, shape index: {}]   ;;  %s1433_s4 = inlined_call_operand.vmem [shape: f32[8,2], index: 4, kind: output, shape index: {}]  }
   0x1   :  { %s15_s16 = sshll.u32 %s1221_s15, 4  ;;  %s16_s16 = int_to_ptr.vmem [resolvable:$true] %s15_s16 }
   0x2   :  { %s1207_s17 = scalar_lea.vmem %s16_s16, 1024  ;;  %p1212_p1 = scmp.lt.s32.totalorder %s16_s16, %s16_s16 }
   0x3   :  { %p1208_p0 = scmp.ne.s32.totalorder %s16_s16, %s1207_s17  ;;  %p1213_p2 = scmp.lt.s32.totalorder %s1207_s17, %s1207_s17 }
   0x5   :  { %p1214_p3 = por %p1213_p2, %p1212_p1 }
   0x7   :  { %p1215_p4 = pnand %p1214_p3, %p1208_p0 }
   0x9   :  { %1218 = shalt.err (!%p1215_p4)
}
   0xa   :  { %s1222_s18 = smov 128   ;;  %s1223_s19 = smov 8  }
   0xb   :  { %21 = dma.hbm_to_vmem [thread:$0]  %s1429_s0, 1024, %s16_s16, [#allocation5], %s1222_s18, %s1222_s18, %s1223_s19  }
   0xc   :  { %1219 = dma.done.wait [#allocation5], 1024  }
   0xd   :  { %1220 = vsyncadd [#allocation5], 4294966272  ;;  %vm35_vm0 = vcmask 261120   ;;  %v1224_v0 = vmov 0.0   ;;  %vm1225_vm1 = vmmov 0   ;;  %v1270_v1 = vld [vmem:[%s1430_s1 + $0x18] sm:$0xff] }
   0xe   :  { %1028 = vmatprep.subr.mxu0 %v1224_v0  ;;  %1036 = vmatprep.mubr.msk.f32.mxu0 %vm1225_vm1, %v1224_v0  ;;  %36 = vst.msk [vmem:[#allocation2] sm:$0xff] %vm35_vm0, %v1224_v0  ;;  %37 = vst.msk [vmem:[#allocation3] sm:$0xff] %vm35_vm0, %v1224_v0  ;;  %v1275_v2 = vld [vmem:[%s1430_s1 + $0x10] sm:$0xff]  ;;  %v1283_v3 = vld [vmem:[%s1430_s1 + $0x8] sm:$0xff]  ;;  %s1227_s29 = smov 32   ;;  %s1228_s12 = smov 96  }
   0xf   :  { %1039 = vmatprep.subr.mxu1 %v1224_v0  ;;  %1047 = vmatprep.mubr.msk.f32.mxu1 %vm1225_vm1, %v1224_v0  ;;  %v1292_v4 = vld [vmem:[%s1430_s1] sm:$0xff]  ;;  %v44_v6 = vld [vmem:[#allocation4] sm:$0xff]  ;;  %s1226_s1 = smov 64   ;;  %v149_v26 = vld [vmem:[#allocation4 + $0x8] sm:$0xff]  ;;  %vm958_vm2 = vcmask 15360  }
  0x10   :  { %1029 = vmatpush3.msra.mxu0 %v1270_v1  ;;  %1040 = vmatpush3.msra.mxu1 %v1270_v1  ;;  %v251_v44 = vld [vmem:[#allocation4 + $0x10] sm:$0xff]  ;;  %v353_v62 = vld [vmem:[#allocation4 + $0x18] sm:$0xff] }
  0x11   :  { %1030 = vmatprep.subr.mxu0 %v1224_v0  ;;  %1041 = vmatprep.subr.mxu1 %v1224_v0 }
  0x12   :  { %1031 = vmatpush3.msra.mxu0 %v1275_v2  ;;  %1042 = vmatpush3.msra.mxu1 %v1275_v2 }
  0x13   :  { %1032 = vmatprep.subr.mxu0 %v1224_v0  ;;  %1043 = vmatprep.subr.mxu1 %v1224_v0 }
  0x14   :  { %1033 = vmatpush3.msra.mxu0 %v1283_v3  ;;  %1044 = vmatpush3.msra.mxu1 %v1283_v3 }
  0x15   :  { %v42_v5 = vld [vmem:[#allocation2] sm:$0xff]  ;;  %1034 = vmatprep.subr.mxu0 %v1224_v0  ;;  %1045 = vmatprep.subr.mxu1 %v1224_v0  ;;  %v43_v11 = vld [vmem:[#allocation3] sm:$0xff] }
  0x16   :  { %1035 = vmatpush3.msra.mxu0 %v1292_v4  ;;  %1046 = vmatpush3.msra.mxu1 %v1292_v4 }
  0x17   :  { %1037 = vmatmul.mubr.msk.f32.vlgmr.msra.gmra.mxu0 %vm35_vm0, %v42_v5  ;;  %1050 = vmatprep.subr.mxu0 %v1224_v0 }
  0x18   :  { %1051 = vmatpush3.msra.mxu0 %v1270_v1  ;;  %1058 = vmatprep.mubr.msk.f32.mxu0 %vm1225_vm1, %v1224_v0 }
  0x19   :  { %1052 = vmatprep.subr.mxu0 %v1224_v0  ;;  %1061 = vmatprep.subr.mxu1 %v1224_v0 }
  0x1a   :  { %1053 = vmatpush3.msra.mxu0 %v1275_v2 }
  0x1b   :  { %1054 = vmatprep.subr.mxu0 %v1224_v0 }
  0x1c   :  { %1055 = vmatpush3.msra.mxu0 %v1283_v3 }
  0x1d   :  { %1056 = vmatprep.subr.mxu0 %v1224_v0 }
  0x1e   :  { %1057 = vmatpush3.msra.mxu0 %v1292_v4 }
  0x1f   :  { %1072 = vmatprep.subr.mxu0 %v1224_v0 }
  0xd7   :  { %v115_v7 = vpop.f32.mrf.mxu0 }
  0xd8   :  { %v119_v8 = vadd.f32 %v115_v7, %v44_v6 }
  0xd9   :  { %v1038_v9 = vpop.f32.mrf.mxu0 }
  0xda   :  { %1135 = vtanh.f32 %v119_v8  ;;  %v966_v12 = vmul.f32 -1.442695, %v119_v8 }
  0xdc   :  { %1137 = vpow2.f32 %v966_v12 }
  0xe7   :  { %v1136_v10 = vpop.eup %1135 }
  0xe8   :  { %133 = vrot.lane.b32.xlu0 %v1136_v10, %s1226_s1 }
  0xe9   :  { %v1138_v13 = vpop.eup %1137 }
  0xea   :  { %v123_v14 = vadd.f32 1.0, %v1138_v13 }
  0xec   :  { %128 = vrot.lane.b32.xlu0 %v43_v11, %s1227_s29  ;;  %1139 = vrcp.f32 %v123_v14 }
  0xf9   :  { %v1140_v15 = vpop.eup %1139 }
 0x15a   :  { %v134_v16 = vpop.permute.xlu0 %133 }
 0x15b   :  { %v136_v17 = vmul.f32 %v1140_v15, %v134_v16 }
 0x15d   :  { %138 = vrot.lane.b32.xlu1 %v136_v17, %s1227_s29 }
 0x15e   :  { %v129_v18 = vpop.permute.xlu0 %128 }
 0x15f   :  { %v131_v19 = vmul.f32 %v1140_v15, %v129_v18 }
 0x1cf   :  { %v139_v20 = vpop.permute.xlu1 %138 }
 0x1d0   :  { %v141_v21 = vadd.f32 %v139_v20, %v131_v19 }
 0x1d2   :  { %1141 = vtanh.f32 %v141_v21 }
 0x1df   :  { %v1142_v22 = vpop.eup %1141 }
 0x1e0   :  { %144 = vrot.lane.b32.xlu1 %v1142_v22, %s1226_s1 }
 0x252   :  { %v145_v23 = vpop.permute.xlu1 %144 }
 0x253   :  { %v147_v24 = vmul.f32 %v1140_v15, %v145_v23 }
 0x255   :  { %151 = vrot.lane.b32.xlu0 %v147_v24, %s1227_s29 }
 0x2c7   :  { %v152_v25 = vpop.permute.xlu0 %151 }
 0x2c8   :  { %1048 = vmatmul.mubr.msk.f32.vlgmr.msra.gmra.mxu1 %vm35_vm0, %v152_v25 }
 0x2c9   :  { %1062 = vmatpush3.msra.mxu1 %v1270_v1  ;;  %1069 = vmatprep.mubr.msk.f32.mxu1 %vm1225_vm1, %v1224_v0 }
 0x2ca   :  { %1063 = vmatprep.subr.mxu1 %v1224_v0 }
 0x2cb   :  { %1064 = vmatpush3.msra.mxu1 %v1275_v2 }
 0x2cc   :  { %1065 = vmatprep.subr.mxu1 %v1224_v0 }
 0x2cd   :  { %1066 = vmatpush3.msra.mxu1 %v1283_v3 }
 0x2ce   :  { %1067 = vmatprep.subr.mxu1 %v1224_v0 }
 0x2cf   :  { %1068 = vmatpush3.msra.mxu1 %v1292_v4 }
 0x2d0   :  { %1083 = vmatprep.subr.mxu1 %v1224_v0 }
 0x388   :  { %v221_v27 = vpop.f32.mrf.mxu1 }
 0x389   :  { %v225_v28 = vadd.f32 %v221_v27, %v149_v26 }
 0x38a   :  { %v1049_v29 = vpop.f32.mrf.mxu1 }
 0x38b   :  { %1143 = vtanh.f32 %v225_v28  ;;  %v968_v31 = vmul.f32 -1.442695, %v225_v28 }
 0x38d   :  { %1145 = vpow2.f32 %v968_v31 }
 0x398   :  { %v1144_v30 = vpop.eup %1143 }
 0x399   :  { %235 = vrot.lane.b32.xlu1 %v1144_v30, %s1226_s1 }
 0x39a   :  { %v1146_v32 = vpop.eup %1145 }
 0x39b   :  { %v229_v33 = vadd.f32 1.0, %v1146_v32 }
 0x39d   :  { %1147 = vrcp.f32 %v229_v33 }
 0x3aa   :  { %v1148_v34 = vpop.eup %1147 }
 0x3ab   :  { %v233_v37 = vmul.f32 %v1148_v34, %v141_v21  ;;  %v455_v21 = vld [vmem:[#allocation4 + $0x20] sm:$0xff] }
 0x40b   :  { %v236_v35 = vpop.permute.xlu1 %235 }
 0x40c   :  { %v238_v36 = vmul.f32 %v1148_v34, %v236_v35 }
 0x40e   :  { %240 = vrot.lane.b32.xlu0 %v238_v36, %s1227_s29 }
 0x480   :  { %v241_v38 = vpop.permute.xlu0 %240 }
 0x481   :  { %v243_v39 = vadd.f32 %v241_v38, %v233_v37 }
 0x483   :  { %1149 = vtanh.f32 %v243_v39 }
 0x490   :  { %v1150_v40 = vpop.eup %1149 }
 0x491   :  { %246 = vrot.lane.b32.xlu1 %v1150_v40, %s1226_s1 }
 0x503   :  { %v247_v41 = vpop.permute.xlu1 %246 }
 0x504   :  { %v249_v42 = vmul.f32 %v1148_v34, %v247_v41 }
 0x506   :  { %253 = vrot.lane.b32.xlu0 %v249_v42, %s1227_s29 }
 0x578   :  { %v254_v43 = vpop.permute.xlu0 %253 }
 0x579   :  { %1059 = vmatmul.mubr.msk.f32.vlgmr.msra.gmra.mxu0 %vm35_vm0, %v254_v43 }
 0x57a   :  { %1073 = vmatpush3.msra.mxu0 %v1270_v1  ;;  %1080 = vmatprep.mubr.msk.f32.mxu0 %vm1225_vm1, %v1224_v0 }
 0x57b   :  { %1074 = vmatprep.subr.mxu0 %v1224_v0 }
 0x57c   :  { %1075 = vmatpush3.msra.mxu0 %v1275_v2 }
 0x57d   :  { %1076 = vmatprep.subr.mxu0 %v1224_v0 }
 0x57e   :  { %1077 = vmatpush3.msra.mxu0 %v1283_v3 }
 0x57f   :  { %1078 = vmatprep.subr.mxu0 %v1224_v0 }
 0x580   :  { %1079 = vmatpush3.msra.mxu0 %v1292_v4 }
 0x581   :  { %1094 = vmatprep.subr.mxu0 %v1224_v0 }
 0x639   :  { %v323_v45 = vpop.f32.mrf.mxu0 }
 0x63a   :  { %v327_v46 = vadd.f32 %v323_v45, %v251_v44 }
 0x63b   :  { %v1060_v47 = vpop.f32.mrf.mxu0 }
 0x63c   :  { %1151 = vtanh.f32 %v327_v46  ;;  %v970_v49 = vmul.f32 -1.442695, %v327_v46 }
 0x63e   :  { %1153 = vpow2.f32 %v970_v49 }
 0x649   :  { %v1152_v48 = vpop.eup %1151 }
 0x64a   :  { %337 = vrot.lane.b32.xlu1 %v1152_v48, %s1226_s1 }
 0x64b   :  { %v1154_v50 = vpop.eup %1153 }
 0x64c   :  { %v331_v51 = vadd.f32 1.0, %v1154_v50 }
 0x64e   :  { %1155 = vrcp.f32 %v331_v51 }
 0x65b   :  { %v1156_v52 = vpop.eup %1155 }
 0x65c   :  { %v335_v55 = vmul.f32 %v1156_v52, %v243_v39  ;;  %v557_v39 = vld [vmem:[#allocation4 + $0x28] sm:$0xff] }
 0x6bc   :  { %v338_v53 = vpop.permute.xlu1 %337 }
 0x6bd   :  { %v340_v54 = vmul.f32 %v1156_v52, %v338_v53  ;;  %v659_v53 = vld [vmem:[#allocation4 + $0x30] sm:$0xff] }
 0x6bf   :  { %342 = vrot.lane.b32.xlu0 %v340_v54, %s1227_s29 }
 0x731   :  { %v343_v56 = vpop.permute.xlu0 %342 }
 0x732   :  { %v345_v57 = vadd.f32 %v343_v56, %v335_v55 }
 0x734   :  { %1157 = vtanh.f32 %v345_v57 }
 0x741   :  { %v1158_v58 = vpop.eup %1157 }
 0x742   :  { %348 = vrot.lane.b32.xlu1 %v1158_v58, %s1226_s1 }
 0x7b4   :  { %v349_v59 = vpop.permute.xlu1 %348 }
 0x7b5   :  { %v351_v60 = vmul.f32 %v1156_v52, %v349_v59 }
 0x7b7   :  { %355 = vrot.lane.b32.xlu0 %v351_v60, %s1227_s29 }
 0x829   :  { %v356_v61 = vpop.permute.xlu0 %355 }
 0x82a   :  { %1070 = vmatmul.mubr.msk.f32.vlgmr.msra.gmra.mxu1 %vm35_vm0, %v356_v61 }
 0x82b   :  { %1084 = vmatpush3.msra.mxu1 %v1270_v1  ;;  %1091 = vmatprep.mubr.msk.f32.mxu1 %vm1225_vm1, %v1224_v0 }
 0x82c   :  { %1085 = vmatprep.subr.mxu1 %v1224_v0 }
 0x82d   :  { %1086 = vmatpush3.msra.mxu1 %v1275_v2 }
 0x82e   :  { %1087 = vmatprep.subr.mxu1 %v1224_v0 }
 0x82f   :  { %1088 = vmatpush3.msra.mxu1 %v1283_v3 }
 0x830   :  { %1089 = vmatprep.subr.mxu1 %v1224_v0 }
 0x831   :  { %1090 = vmatpush3.msra.mxu1 %v1292_v4 }
 0x832   :  { %1105 = vmatprep.subr.mxu1 %v1224_v0 }
 0x8ea   :  { %v425_v63 = vpop.f32.mrf.mxu1 }
 0x8eb   :  { %v429_v5 = vadd.f32 %v425_v63, %v353_v62 }
 0x8ec   :  { %v1071_v6 = vpop.f32.mrf.mxu1 }
 0x8ed   :  { %1159 = vtanh.f32 %v429_v5  ;;  %v972_v8 = vmul.f32 -1.442695, %v429_v5 }
 0x8ef   :  { %1161 = vpow2.f32 %v972_v8 }
 0x8fa   :  { %v1160_v7 = vpop.eup %1159 }
 0x8fb   :  { %439 = vrot.lane.b32.xlu1 %v1160_v7, %s1226_s1 }
 0x8fc   :  { %v1162_v9 = vpop.eup %1161 }
 0x8fd   :  { %v433_v10 = vadd.f32 1.0, %v1162_v9 }
 0x8ff   :  { %1163 = vrcp.f32 %v433_v10 }
 0x90c   :  { %v1164_v11 = vpop.eup %1163 }
 0x90d   :  { %v437_v14 = vmul.f32 %v1164_v11, %v345_v57 }
 0x96d   :  { %v440_v12 = vpop.permute.xlu1 %439 }
 0x96e   :  { %v442_v13 = vmul.f32 %v1164_v11, %v440_v12  ;;  %v761_v12 = vld [vmem:[#allocation4 + $0x38] sm:$0xff] }
 0x970   :  { %444 = vrot.lane.b32.xlu0 %v442_v13, %s1227_s29 }
 0x9e2   :  { %v445_v15 = vpop.permute.xlu0 %444 }
 0x9e3   :  { %v447_v16 = vadd.f32 %v445_v15, %v437_v14 }
 0x9e5   :  { %1165 = vtanh.f32 %v447_v16 }
 0x9f2   :  { %v1166_v17 = vpop.eup %1165 }
 0x9f3   :  { %450 = vrot.lane.b32.xlu1 %v1166_v17, %s1226_s1 }
 0xa65   :  { %v451_v18 = vpop.permute.xlu1 %450 }
 0xa66   :  { %v453_v19 = vmul.f32 %v1164_v11, %v451_v18 }
 0xa68   :  { %457 = vrot.lane.b32.xlu0 %v453_v19, %s1227_s29 }
 0xada   :  { %v458_v20 = vpop.permute.xlu0 %457 }
 0xadb   :  { %1081 = vmatmul.mubr.msk.f32.vlgmr.msra.gmra.mxu0 %vm35_vm0, %v458_v20 }
 0xadc   :  { %1095 = vmatpush3.msra.mxu0 %v1270_v1  ;;  %1102 = vmatprep.mubr.msk.f32.mxu0 %vm1225_vm1, %v1224_v0 }
 0xadd   :  { %1096 = vmatprep.subr.mxu0 %v1224_v0 }
 0xade   :  { %1097 = vmatpush3.msra.mxu0 %v1275_v2 }
 0xadf   :  { %1098 = vmatprep.subr.mxu0 %v1224_v0 }
 0xae0   :  { %1099 = vmatpush3.msra.mxu0 %v1283_v3 }
 0xae1   :  { %1100 = vmatprep.subr.mxu0 %v1224_v0 }
 0xae2   :  { %1101 = vmatpush3.msra.mxu0 %v1292_v4 }
 0xae3   :  { %1116 = vmatprep.subr.mxu0 %v1224_v0 }
 0xb9b   :  { %v527_v22 = vpop.f32.mrf.mxu0 }
 0xb9c   :  { %v531_v23 = vadd.f32 %v527_v22, %v455_v21 }
 0xb9d   :  { %v1082_v24 = vpop.f32.mrf.mxu0 }
 0xb9e   :  { %1167 = vtanh.f32 %v531_v23  ;;  %v974_v26 = vmul.f32 -1.442695, %v531_v23 }
 0xba0   :  { %1169 = vpow2.f32 %v974_v26  ;;  %v878_v26 = vld [vmem:[%s1431_s2 + $0x18] sm:$0xff] }
 0xbab   :  { %v1168_v25 = vpop.eup %1167 }
 0xbac   :  { %541 = vrot.lane.b32.xlu1 %v1168_v25, %s1226_s1 }
 0xbad   :  { %v1170_v27 = vpop.eup %1169 }
 0xbae   :  { %v535_v28 = vadd.f32 1.0, %v1170_v27  ;;  %v877_v27 = vld [vmem:[%s1431_s2 + $0x10] sm:$0xff] }
 0xbb0   :  { %1171 = vrcp.f32 %v535_v28  ;;  %v876_v28 = vld [vmem:[%s1431_s2 + $0x8] sm:$0xff] }
 0xbbd   :  { %v1172_v29 = vpop.eup %1171 }
 0xbbe   :  { %v539_v32 = vmul.f32 %v1172_v29, %v447_v16 }
 0xc1e   :  { %v542_v30 = vpop.permute.xlu1 %541 }
 0xc1f   :  { %v544_v31 = vmul.f32 %v1172_v29, %v542_v30 }
 0xc21   :  { %546 = vrot.lane.b32.xlu0 %v544_v31, %s1227_s29 }
 0xc93   :  { %v547_v33 = vpop.permute.xlu0 %546 }
 0xc94   :  { %v549_v34 = vadd.f32 %v547_v33, %v539_v32 }
 0xc96   :  { %1173 = vtanh.f32 %v549_v34 }
 0xca3   :  { %v1174_v35 = vpop.eup %1173 }
 0xca4   :  { %552 = vrot.lane.b32.xlu1 %v1174_v35, %s1226_s1 }
 0xd16   :  { %v553_v36 = vpop.permute.xlu1 %552 }
 0xd17   :  { %v555_v37 = vmul.f32 %v1172_v29, %v553_v36  ;;  %v875_v29 = vld [vmem:[%s1431_s2] sm:$0xff] }
 0xd19   :  { %559 = vrot.lane.b32.xlu0 %v555_v37, %s1227_s29 }
 0xd8b   :  { %v560_v38 = vpop.permute.xlu0 %559 }
 0xd8c   :  { %1092 = vmatmul.mubr.msk.f32.vlgmr.msra.gmra.mxu1 %vm35_vm0, %v560_v38 }
 0xd8d   :  { %1106 = vmatpush3.msra.mxu1 %v1270_v1  ;;  %1113 = vmatprep.mubr.msk.f32.mxu1 %vm1225_vm1, %v1224_v0 }
 0xd8e   :  { %1107 = vmatprep.subr.mxu1 %v1224_v0 }
 0xd8f   :  { %1108 = vmatpush3.msra.mxu1 %v1275_v2 }
 0xd90   :  { %1109 = vmatprep.subr.mxu1 %v1224_v0 }
 0xd91   :  { %1110 = vmatpush3.msra.mxu1 %v1283_v3 }
 0xd92   :  { %1111 = vmatprep.subr.mxu1 %v1224_v0 }
 0xd93   :  { %1112 = vmatpush3.msra.mxu1 %v1292_v4 }
 0xe4c   :  { %v629_v40 = vpop.f32.mrf.mxu1 }
 0xe4d   :  { %v633_v41 = vadd.f32 %v629_v40, %v557_v39 }
 0xe4e   :  { %v1093_v42 = vpop.f32.mrf.mxu1 }
 0xe4f   :  { %1175 = vtanh.f32 %v633_v41  ;;  %v976_v43 = vmul.f32 -1.442695, %v633_v41 }
 0xe51   :  { %1177 = vpow2.f32 %v976_v43 }
 0xe5c   :  { %v1176_v1 = vpop.eup %1175 }
 0xe5d   :  { %643 = vrot.lane.b32.xlu1 %v1176_v1, %s1226_s1 }
 0xe5e   :  { %v1178_v44 = vpop.eup %1177 }
 0xe5f   :  { %v637_v2 = vadd.f32 1.0, %v1178_v44 }
 0xe61   :  { %1179 = vrcp.f32 %v637_v2 }
 0xe6e   :  { %v1180_v45 = vpop.eup %1179 }
 0xe6f   :  { %v641_v47 = vmul.f32 %v1180_v45, %v549_v34 }
 0xecf   :  { %v644_v46 = vpop.permute.xlu1 %643 }
 0xed0   :  { %v646_v3 = vmul.f32 %v1180_v45, %v644_v46 }
 0xed2   :  { %648 = vrot.lane.b32.xlu0 %v646_v3, %s1227_s29 }
 0xf44   :  { %v649_v4 = vpop.permute.xlu0 %648 }
 0xf45   :  { %v651_v48 = vadd.f32 %v649_v4, %v641_v47 }
 0xf47   :  { %1181 = vtanh.f32 %v651_v48 }
 0xf54   :  { %v1182_v49 = vpop.eup %1181 }
 0xf55   :  { %654 = vrot.lane.b32.xlu1 %v1182_v49, %s1226_s1 }
 0xfc7   :  { %v655_v50 = vpop.permute.xlu1 %654 }
 0xfc8   :  { %v657_v51 = vmul.f32 %v1180_v45, %v655_v50 }
 0xfca   :  { %661 = vrot.lane.b32.xlu0 %v657_v51, %s1227_s29 }
0x103c   :  { %v662_v52 = vpop.permute.xlu0 %661 }
0x103d   :  { %1103 = vmatmul.mubr.msk.f32.vlgmr.msra.gmra.mxu0 %vm35_vm0, %v662_v52 }
0x103e   :  { %1124 = vmatprep.mubr.msk.f32.mxu0 %vm1225_vm1, %v1224_v0  ;;  %1117 = vmatpush3.msra.mxu0 %v878_v26 }
0x103f   :  { %1118 = vmatprep.subr.mxu0 %v1224_v0 }
0x1040   :  { %1119 = vmatpush3.msra.mxu0 %v877_v27 }
0x1041   :  { %1120 = vmatprep.subr.mxu0 %v1224_v0 }
0x1042   :  { %1121 = vmatpush3.msra.mxu0 %v876_v28 }
0x1043   :  { %1122 = vmatprep.subr.mxu0 %v1224_v0  ;;  %v981_v0 = vld [vmem:[%s1432_s3] ss:$0 sm:$0xff] }
0x1044   :  { %1123 = vmatpush3.msra.mxu0 %v875_v29 }
0x10fd   :  { %v731_v54 = vpop.f32.mrf.mxu0 }
0x10fe   :  { %v735_v55 = vadd.f32 %v731_v54, %v659_v53 }
0x10ff   :  { %v1104_v56 = vpop.f32.mrf.mxu0 }
0x1100   :  { %1183 = vtanh.f32 %v735_v55  ;;  %v978_v58 = vmul.f32 -1.442695, %v735_v55 }
0x1102   :  { %1185 = vpow2.f32 %v978_v58 }
0x110d   :  { %v1184_v57 = vpop.eup %1183 }
0x110e   :  { %745 = vrot.lane.b32.xlu1 %v1184_v57, %s1226_s1 }
0x110f   :  { %v1186_v59 = vpop.eup %1185 }
0x1110   :  { %v739_v60 = vadd.f32 1.0, %v1186_v59 }
0x1112   :  { %1187 = vrcp.f32 %v739_v60 }
0x111f   :  { %v1188_v61 = vpop.eup %1187 }
0x1120   :  { %v743_v5 = vmul.f32 %v1188_v61, %v651_v48 }
0x1180   :  { %v746_v62 = vpop.permute.xlu1 %745 }
0x1181   :  { %v748_v63 = vmul.f32 %v1188_v61, %v746_v62 }
0x1183   :  { %750 = vrot.lane.b32.xlu0 %v748_v63, %s1227_s29 }
0x11f5   :  { %v751_v6 = vpop.permute.xlu0 %750 }
0x11f6   :  { %v753_v7 = vadd.f32 %v751_v6, %v743_v5 }
0x11f8   :  { %1189 = vtanh.f32 %v753_v7 }
0x1205   :  { %v1190_v8 = vpop.eup %1189 }
0x1206   :  { %756 = vrot.lane.b32.xlu1 %v1190_v8, %s1226_s1 }
0x1278   :  { %v757_v9 = vpop.permute.xlu1 %756 }
0x1279   :  { %v759_v10 = vmul.f32 %v1188_v61, %v757_v9 }
0x127b   :  { %763 = vrot.lane.b32.xlu0 %v759_v10, %s1227_s29 }
0x12ed   :  { %v764_v11 = vpop.permute.xlu0 %763 }
0x12ee   :  { %1114 = vmatmul.mubr.msk.f32.vlgmr.msra.gmra.mxu1 %vm35_vm0, %v764_v11 }
0x13ae   :  { %v833_v13 = vpop.f32.mrf.mxu1 }
0x13af   :  { %v837_v14 = vadd.f32 %v833_v13, %v761_v12 }
0x13b0   :  { %v1115_v15 = vpop.f32.mrf.mxu1 }
0x13b1   :  { %1191 = vtanh.f32 %v837_v14  ;;  %v980_v17 = vmul.f32 -1.442695, %v837_v14 }
0x13b3   :  { %1193 = vpow2.f32 %v980_v17 }
0x13be   :  { %v1192_v16 = vpop.eup %1191 }
0x13bf   :  { %847 = vrot.lane.b32.xlu1 %v1192_v16, %s1226_s1 }
0x13c0   :  { %v1194_v18 = vpop.eup %1193 }
0x13c1   :  { %v841_v19 = vadd.f32 1.0, %v1194_v18 }
0x13c3   :  { %1195 = vrcp.f32 %v841_v19 }
0x13d0   :  { %v1196_v20 = vpop.eup %1195 }
0x13d1   :  { %v845_v23 = vmul.f32 %v1196_v20, %v753_v7 }
0x1431   :  { %v848_v21 = vpop.permute.xlu1 %847 }
0x1432   :  { %v850_v22 = vmul.f32 %v1196_v20, %v848_v21 }
0x1434   :  { %852 = vrot.lane.b32.xlu0 %v850_v22, %s1227_s29 }
0x14a6   :  { %v853_v24 = vpop.permute.xlu0 %852 }
0x14a7   :  { %v855_v25 = vadd.f32 %v853_v24, %v845_v23 }
0x14a9   :  { %1197 = vtanh.f32 %v855_v25 }
0x14b6   :  { %v1198_v30 = vpop.eup %1197 }
0x14b7   :  { %858 = vrot.lane.b32.xlu1 %v1198_v30, %s1226_s1 }
0x14bb   :  { %868 = vrot.lane.b32.xlu1 %v855_v25, %s1228_s12 }
0x1529   :  { %v859_v31 = vpop.permute.xlu1 %858 }
0x152a   :  { %v861_v32 = vmul.f32 %v1196_v20, %v859_v31 }
0x152c   :  { %863 = vrot.lane.b32.xlu0 %v861_v32, %s1227_s29 }
0x152d   :  { %v869_v33 = vpop.permute.xlu1 %868 }
0x152e   :  { %871 = vst.msk [vmem:[#allocation3] sm:$0xff] %vm35_vm0, %v869_v33 }
0x159e   :  { %v864_v34 = vpop.permute.xlu0 %863 }
0x159f   :  { %866 = vst.msk [vmem:[#allocation2] sm:$0xff] %vm35_vm0, %v864_v34  ;;  %1125 = vmatmul.mubr.msk.f32.vlgmr.msra.gmra.mxu0 %vm35_vm0, %v864_v34 }
0x165f   :  { %v954_v35 = vpop.f32.mrf.mxu0 }
0x1660   :  { %v955_v36 = vadd.f32 %v981_v0, %v954_v35 }
0x1661   :  { %v1126_v37 = vpop.f32.mrf.mxu0 }
0x1662   :  { %959 = vst.msk [vmem:[%s1433_s4] sm:$0xff] %vm958_vm2, %v955_v36 }
0x1663   :  { %964 = vsyncpa [#allocation5], 1 }

</bundles_post_ra>
